<compile_context>
chip_gen: v7x
topology: tpu7x:2x2x1
jax: 0.10.0
libtpu: 0.0.40
codegen_flags: <defaults>
</compile_context>

<pallas_src>
import functools

import jax
import jax.numpy as jnp
import numpy as np
from jax.experimental import pallas as pl
from jax.experimental.pallas import tpu as pltpu

_LANES = 128
_SUBLANES = 8


def _cdiv(a, b):
    return -(-a // b)


def _cc_moments_kernel(s_ref, g_ref, o_ref, *, rows_valid, block_rows, need_mask):
    """Accumulate the five raw moments of one (block_rows, 128) tile.

    o_ref block is (1, 5, 8, 128): [sum_s, sum_g, sum_ss, sum_gg, sum_sg],
    kept lane/sublane-resident; it stays resident across the 'arbitrary' axis.
    """
    kb = pl.program_id(1)

    @pl.when(kb == 0)
    def _init():
        o_ref[...] = jnp.zeros_like(o_ref)

    s = s_ref[...].astype(jnp.float32)
    g = g_ref[...].astype(jnp.float32)

    if need_mask:  # static Python bool: only emitted when coverage overruns
        c = pl.program_id(0)
        row0 = (c * pl.num_programs(1) + kb) * block_rows
        rid = jax.lax.broadcasted_iota(jnp.int32, s.shape, 0) + row0
        keep = rid < rows_valid
        s = jnp.where(keep, s, 0.0)
        g = jnp.where(keep, g, 0.0)

    def fold(x):
        # (block_rows, 128) -> (block_rows//8, 8, 128) is layout-preserving;
        # the axis-0 sum is vreg-wise VPU adds only (no cross-lane reduce).
        return jnp.sum(x.reshape(-1, _SUBLANES, _LANES), axis=0)

    o_ref[0, 0] += fold(s)
    o_ref[0, 1] += fold(g)
    o_ref[0, 2] += fold(s * s)
    o_ref[0, 3] += fold(g * g)
    o_ref[0, 4] += fold(s * g)


def cc_loss(saliency_map, gtruth, *, tile_rows=2048, num_splits=2):
    """Pallas TPU implementation of CC_Loss.forward (returns an f32 scalar)."""
    assert saliency_map.shape == gtruth.shape
    n_elems = int(np.prod(saliency_map.shape))
    chunk = _SUBLANES * _LANES

    # Flatten (free for contiguous arrays); native dtype goes straight in.
    s_flat = saliency_map.reshape(-1)
    g_flat = gtruth.reshape(-1)

    # Only pad when numel is not a multiple of 8*128 (zeros contribute nothing
    # to any raw moment; the true N is used for the means below).
    rem = n_elems % chunk
    if rem:
        pad = chunk - rem
        s_flat = jnp.pad(s_flat, (0, pad))
        g_flat = jnp.pad(g_flat, (0, pad))

    rows = s_flat.shape[0] // _LANES  # multiple of 8
    s2d = s_flat.reshape(rows, _LANES)
    g2d = g_flat.reshape(rows, _LANES)

    tile_rows = max(_SUBLANES, (tile_rows // _SUBLANES) * _SUBLANES)
    block_rows = min(tile_rows, rows)          # multiple of 8
    total_blocks = _cdiv(rows, block_rows)
    bps = _cdiv(total_blocks, num_splits)      # blocks per split (arbitrary axis)
    need_mask = (num_splits * bps * block_rows) != rows

    def in_map(c, kb):
        # Clamp so over-coverage blocks re-read the last real block; their
        # contribution is zeroed by the in-kernel row mask.
        return (jnp.minimum(c * bps + kb, total_blocks - 1), 0)

    kernel = functools.partial(
        _cc_moments_kernel,
        rows_valid=rows,
        block_rows=block_rows,
        need_mask=need_mask,
    )

    partial_moments = pl.pallas_call(
        kernel,
        out_shape=jax.ShapeDtypeStruct((num_splits, 5, _SUBLANES, _LANES), jnp.float32),
        grid_spec=pltpu.PrefetchScalarGridSpec(
            num_scalar_prefetch=0,
            grid=(num_splits, bps),
            in_specs=[
                pl.BlockSpec((block_rows, _LANES), in_map),
                pl.BlockSpec((block_rows, _LANES), in_map),
            ],
            out_specs=pl.BlockSpec(
                (1, 5, _SUBLANES, _LANES), lambda c, kb: (c, 0, 0, 0)
            ),
        ),
        compiler_params=pltpu.CompilerParams(
            dimension_semantics=("parallel", "arbitrary")
        ),
    )(s2d, g2d)

    # Combine per-split lane-resident partials and do the scalar math once.
    sums = jnp.sum(partial_moments, axis=(0, 2, 3))  # (5,) f32
    n = jnp.float32(n_elems)
    sum_s, sum_g, sum_ss, sum_gg, sum_sg = sums[0], sums[1], sums[2], sums[3], sums[4]
    cov = sum_sg - sum_s * sum_g / n
    var_s = jnp.maximum(sum_ss - sum_s * sum_s / n, 0.0)
    var_g = jnp.maximum(sum_gg - sum_g * sum_g / n, 0.0)
    return cov / (jnp.sqrt(var_s) * jnp.sqrt(var_g))


def cc_loss_ref(saliency_map, gtruth):
    s = saliency_map.astype(jnp.float32)
    g = gtruth.astype(jnp.float32)
    s = s - jnp.mean(s)
    g = g - jnp.mean(g)
    return jnp.sum(s * g) / (jnp.sqrt(jnp.sum(s ** 2)) * jnp.sqrt(jnp.sum(g ** 2)))


if __name__ == "__main__":
    key = jax.random.PRNGKey(0)
    k1, k2 = jax.random.split(key)
    # NCHW, like the PyTorch module's typical inputs (saliency map + gtruth map)
    shape = (2, 4, 16, 16)
    saliency_map = jax.random.normal(k1, shape, dtype=jnp.float32)
    gtruth = jax.random.uniform(k2, shape, dtype=jnp.float32)

    out = jax.block_until_ready(cc_loss(saliency_map, gtruth))
    ref = jax.block_until_ready(cc_loss_ref(saliency_map, gtruth))
    np.testing.assert_allclose(np.asarray(out), np.asarray(ref), rtol=1e-5, atol=1e-6)
    print("KERNEL_OK")
</pallas_src>

<mosaic_0001>
module attributes {stable_mosaic.version = 11 : i64} {
  func.func @_cc_moments_kernel(%arg0: i32, %arg1: i32, %arg2: memref<16x128xf32, #tpu.memory_space<vmem>>, %arg3: memref<16x128xf32, #tpu.memory_space<vmem>>, %arg4: memref<1x5x8x128xf32, #tpu.memory_space<vmem>>) attributes {dimension_semantics = [#tpu.dimension_semantics<parallel>, #tpu.dimension_semantics<arbitrary>], iteration_bounds = array<i64: 2, 1>, scalar_prefetch = 0 : i64, scratch_operands = 0 : i64, tpu.core_type = #tpu.core_type<tc>, window_params = [{transform_indices = @transform_0, window_bounds = array<i64: 16, 128>}, {transform_indices = @transform_1, window_bounds = array<i64: 16, 128>}, {transform_indices = @transform_2, window_bounds = array<i64: 1, 5, 8, 128>}]} {
    %c0_i32 = arith.constant 0 : i32
    %0 = arith.cmpi eq, %arg1, %c0_i32 : i32
    %1 = arith.extui %0 : i1 to i32
    %c0_i32_0 = arith.constant 0 : i32
    %2 = arith.cmpi ne, %1, %c0_i32_0 : i32
    scf.if %2 {
      %cst_47 = arith.constant 0.000000e+00 : f32
      %60 = vector.broadcast %cst_47 : f32 to vector<1x5x8x128xf32>
      %c0_48 = arith.constant 0 : index
      %c0_49 = arith.constant 0 : index
      %c0_50 = arith.constant 0 : index
      %c0_51 = arith.constant 0 : index
      %61 = vector.load %arg4[%c0_48, %c0_49, %c0_50, %c0_51] : memref<1x5x8x128xf32, #tpu.memory_space<vmem>>, vector<1x5x8x128xf32>
      tpu.vector_store %arg4[%c0_48, %c0_49, %c0_50, %c0_51], %60 {strides = array<i32>} : memref<1x5x8x128xf32, #tpu.memory_space<vmem>>, vector<1x5x8x128xf32>,
    } else {
    }
    %c0 = arith.constant 0 : index
    %c0_1 = arith.constant 0 : index
    %3 = vector.load %arg2[%c0, %c0_1] : memref<16x128xf32, #tpu.memory_space<vmem>>, vector<16x128xf32>
    %c0_2 = arith.constant 0 : index
    %c0_3 = arith.constant 0 : index
    %4 = vector.load %arg3[%c0_2, %c0_3] : memref<16x128xf32, #tpu.memory_space<vmem>>, vector<16x128xf32>
    %c1_i32 = arith.constant 1 : i32
    %5 = arith.muli %arg0, %c1_i32 : i32
    %6 = arith.addi %5, %arg1 : i32
    %c16_i32 = arith.constant 16 : i32
    %7 = arith.muli %6, %c16_i32 : i32
    %8 = tpu.iota {dimensions = array<i32: 0>} : vector<16x128xi32>
    %9 = vector.broadcast %7 : i32 to vector<16x128xi32>
    %10 = arith.addi %8, %9 : vector<16x128xi32>
    %c16_i32_4 = arith.constant 16 : i32
    %11 = vector.broadcast %c16_i32_4 : i32 to vector<16x128xi32>
    %12 = arith.cmpi slt, %10, %11 : vector<16x128xi32>
    %cst = arith.constant 0.000000e+00 : f32
    %13 = vector.broadcast %cst : f32 to vector<16x128xf32>
    %14 = arith.select %12, %3, %13 : vector<16x128xi1>, vector<16x128xf32>
    %cst_5 = arith.constant 0.000000e+00 : f32
    %15 = vector.broadcast %cst_5 : f32 to vector<16x128xf32>
    %16 = arith.select %12, %4, %15 : vector<16x128xi1>, vector<16x128xf32>
    %c0_6 = arith.constant 0 : index
    %c0_7 = arith.constant 0 : index
    %c0_8 = arith.constant 0 : index
    %c0_9 = arith.constant 0 : index
    %17 = vector.load %arg4[%c0_6, %c0_7, %c0_8, %c0_9] : memref<1x5x8x128xf32, #tpu.memory_space<vmem>>, vector<1x1x8x128xf32>
    %18 = vector.shape_cast %17 : vector<1x1x8x128xf32> to vector<8x128xf32>
    %19 = vector.shape_cast %14 : vector<16x128xf32> to vector<2x8x128xf32>
    %cst_10 = arith.constant dense<0.000000e+00> : vector<8x128xf32>
    %20 = vector.multi_reduction <add>, %19, %cst_10 [0] : vector<2x8x128xf32> to vector<8x128xf32>
    %21 = arith.addf %18, %20 : vector<8x128xf32>
    %c0_11 = arith.constant 0 : index
    %c0_12 = arith.constant 0 : index
    %c0_13 = arith.constant 0 : index
    %c0_14 = arith.constant 0 : index
    %22 = vector.load %arg4[%c0_11, %c0_12, %c0_13, %c0_14] : memref<1x5x8x128xf32, #tpu.memory_space<vmem>>, vector<1x1x8x128xf32>
    %23 = vector.shape_cast %22 : vector<1x1x8x128xf32> to vector<8x128xf32>
    %24 = vector.shape_cast %21 : vector<8x128xf32> to vector<1x1x8x128xf32>
    tpu.vector_store %arg4[%c0_11, %c0_12, %c0_13, %c0_14], %24 {strides = array<i32>} : memref<1x5x8x128xf32, #tpu.memory_space<vmem>>, vector<1x1x8x128xf32>,
    %c0_15 = arith.constant 0 : index
    %c1 = arith.constant 1 : index
    %c0_16 = arith.constant 0 : index
    %c0_17 = arith.constant 0 : index
    %25 = vector.load %arg4[%c0_15, %c1, %c0_16, %c0_17] : memref<1x5x8x128xf32, #tpu.memory_space<vmem>>, vector<1x1x8x128xf32>
    %26 = vector.shape_cast %25 : vector<1x1x8x128xf32> to vector<8x128xf32>
    %27 = vector.shape_cast %16 : vector<16x128xf32> to vector<2x8x128xf32>
    %cst_18 = arith.constant dense<0.000000e+00> : vector<8x128xf32>
    %28 = vector.multi_reduction <add>, %27, %cst_18 [0] : vector<2x8x128xf32> to vector<8x128xf32>
    %29 = arith.addf %26, %28 : vector<8x128xf32>
    %c0_19 = arith.constant 0 : index
    %c1_20 = arith.constant 1 : index
    %c0_21 = arith.constant 0 : index
    %c0_22 = arith.constant 0 : index
    %30 = vector.load %arg4[%c0_19, %c1_20, %c0_21, %c0_22] : memref<1x5x8x128xf32, #tpu.memory_space<vmem>>, vector<1x1x8x128xf32>
    %31 = vector.shape_cast %30 : vector<1x1x8x128xf32> to vector<8x128xf32>
    %32 = vector.shape_cast %29 : vector<8x128xf32> to vector<1x1x8x128xf32>
    tpu.vector_store %arg4[%c0_19, %c1_20, %c0_21, %c0_22], %32 {strides = array<i32>} : memref<1x5x8x128xf32, #tpu.memory_space<vmem>>, vector<1x1x8x128xf32>,
    %c0_23 = arith.constant 0 : index
    %c2 = arith.constant 2 : index
    %c0_24 = arith.constant 0 : index
    %c0_25 = arith.constant 0 : index
    %33 = vector.load %arg4[%c0_23, %c2, %c0_24, %c0_25] : memref<1x5x8x128xf32, #tpu.memory_space<vmem>>, vector<1x1x8x128xf32>
    %34 = vector.shape_cast %33 : vector<1x1x8x128xf32> to vector<8x128xf32>
    %35 = arith.mulf %14, %14 : vector<16x128xf32>
    %36 = vector.shape_cast %35 : vector<16x128xf32> to vector<2x8x128xf32>
    %cst_26 = arith.constant dense<0.000000e+00> : vector<8x128xf32>
    %37 = vector.multi_reduction <add>, %36, %cst_26 [0] : vector<2x8x128xf32> to vector<8x128xf32>
    %38 = arith.addf %34, %37 : vector<8x128xf32>
    %c0_27 = arith.constant 0 : index
    %c2_28 = arith.constant 2 : index
    %c0_29 = arith.constant 0 : index
    %c0_30 = arith.constant 0 : index
    %39 = vector.load %arg4[%c0_27, %c2_28, %c0_29, %c0_30] : memref<1x5x8x128xf32, #tpu.memory_space<vmem>>, vector<1x1x8x128xf32>
    %40 = vector.shape_cast %39 : vector<1x1x8x128xf32> to vector<8x128xf32>
    %41 = vector.shape_cast %38 : vector<8x128xf32> to vector<1x1x8x128xf32>
    tpu.vector_store %arg4[%c0_27, %c2_28, %c0_29, %c0_30], %41 {strides = array<i32>} : memref<1x5x8x128xf32, #tpu.memory_space<vmem>>, vector<1x1x8x128xf32>,
    %c0_31 = arith.constant 0 : index
    %c3 = arith.constant 3 : index
    %c0_32 = arith.constant 0 : index
    %c0_33 = arith.constant 0 : index
    %42 = vector.load %arg4[%c0_31, %c3, %c0_32, %c0_33] : memref<1x5x8x128xf32, #tpu.memory_space<vmem>>, vector<1x1x8x128xf32>
    %43 = vector.shape_cast %42 : vector<1x1x8x128xf32> to vector<8x128xf32>
    %44 = arith.mulf %16, %16 : vector<16x128xf32>
    %45 = vector.shape_cast %44 : vector<16x128xf32> to vector<2x8x128xf32>
    %cst_34 = arith.constant dense<0.000000e+00> : vector<8x128xf32>
    %46 = vector.multi_reduction <add>, %45, %cst_34 [0] : vector<2x8x128xf32> to vector<8x128xf32>
    %47 = arith.addf %43, %46 : vector<8x128xf32>
    %c0_35 = arith.constant 0 : index
    %c3_36 = arith.constant 3 : index
    %c0_37 = arith.constant 0 : index
    %c0_38 = arith.constant 0 : index
    %48 = vector.load %arg4[%c0_35, %c3_36, %c0_37, %c0_38] : memref<1x5x8x128xf32, #tpu.memory_space<vmem>>, vector<1x1x8x128xf32>
    %49 = vector.shape_cast %48 : vector<1x1x8x128xf32> to vector<8x128xf32>
    %50 = vector.shape_cast %47 : vector<8x128xf32> to vector<1x1x8x128xf32>
    tpu.vector_store %arg4[%c0_35, %c3_36, %c0_37, %c0_38], %50 {strides = array<i32>} : memref<1x5x8x128xf32, #tpu.memory_space<vmem>>, vector<1x1x8x128xf32>,
    %c0_39 = arith.constant 0 : index
    %c4 = arith.constant 4 : index
    %c0_40 = arith.constant 0 : index
    %c0_41 = arith.constant 0 : index
    %51 = vector.load %arg4[%c0_39, %c4, %c0_40, %c0_41] : memref<1x5x8x128xf32, #tpu.memory_space<vmem>>, vector<1x1x8x128xf32>
    %52 = vector.shape_cast %51 : vector<1x1x8x128xf32> to vector<8x128xf32>
    %53 = arith.mulf %14, %16 : vector<16x128xf32>
    %54 = vector.shape_cast %53 : vector<16x128xf32> to vector<2x8x128xf32>
    %cst_42 = arith.constant dense<0.000000e+00> : vector<8x128xf32>
    %55 = vector.multi_reduction <add>, %54, %cst_42 [0] : vector<2x8x128xf32> to vector<8x128xf32>
    %56 = arith.addf %52, %55 : vector<8x128xf32>
    %c0_43 = arith.constant 0 : index
    %c4_44 = arith.constant 4 : index
    %c0_45 = arith.constant 0 : index
    %c0_46 = arith.constant 0 : index
    %57 = vector.load %arg4[%c0_43, %c4_44, %c0_45, %c0_46] : memref<1x5x8x128xf32, #tpu.memory_space<vmem>>, vector<1x1x8x128xf32>
    %58 = vector.shape_cast %57 : vector<1x1x8x128xf32> to vector<8x128xf32>
    %59 = vector.shape_cast %56 : vector<8x128xf32> to vector<1x1x8x128xf32>
    tpu.vector_store %arg4[%c0_43, %c4_44, %c0_45, %c0_46], %59 {strides = array<i32>} : memref<1x5x8x128xf32, #tpu.memory_space<vmem>>, vector<1x1x8x128xf32>,
    return
  }
  func.func @transform_0(%arg0: i32, %arg1: i32) -> (i32, i32) {
    %c1_i32 = arith.constant 1 : i32
    %0 = arith.muli %arg0, %c1_i32 : i32
    %1 = arith.addi %0, %arg1 : i32
    %c0_i32 = arith.constant 0 : i32
    %2 = arith.minsi %1, %c0_i32 : i32
    %c0_i32_0 = arith.constant 0 : i32
    %c0_i32_1 = arith.constant 0 : i32
    return %2, %c0_i32_0 : i32, i32
  }
  func.func @transform_1(%arg0: i32, %arg1: i32) -> (i32, i32) {
    %c1_i32 = arith.constant 1 : i32
    %0 = arith.muli %arg0, %c1_i32 : i32
    %1 = arith.addi %0, %arg1 : i32
    %c0_i32 = arith.constant 0 : i32
    %2 = arith.minsi %1, %c0_i32 : i32
    %c0_i32_0 = arith.constant 0 : i32
    %c0_i32_1 = arith.constant 0 : i32
    return %2, %c0_i32_0 : i32, i32
  }
  func.func @transform_2(%arg0: i32, %arg1: i32) -> (i32, i32, i32, i32) {
    %c0_i32 = arith.constant 0 : i32
    %c0_i32_0 = arith.constant 0 : i32
    %c0_i32_1 = arith.constant 0 : i32
    %c0_i32_2 = arith.constant 0 : i32
    return %arg0, %c0_i32, %c0_i32_0, %c0_i32_1 : i32, i32, i32, i32
  }
}

</mosaic_0001>

<bundles_post_ra>
// kernel: tpu_custom_call.1
= control target key start
LH: loop header
LB: loop body
LE: loop exit
PB: predicated region body
PF: predicated region fallthrough
CT: control target
= control target key end

     0   :  { %7 = vsyncpa [#allocation3], 0  ;;  %s942_s0 = inlined_call_operand.hbm [shape: f32[16,128], index: 0, kind: input, shape index: {}]   ;;  %s943_s1 = inlined_call_operand.hbm [shape: f32[16,128], index: 1, kind: input, shape index: {}]   ;;  %s944_s2 = inlined_call_operand.hbm [shape: f32[2,5,8,128], index: 2, kind: output, shape index: {}]  }
   0x1   :  { %9 = vsyncpa [#allocation3 + $0x1], 0 }
   0x2   :  { %10 = vsyncpa [#allocation6], 0 }
   0x3   :  { %12 = vsyncpa [#allocation6 + $0x1], 0 }
   0x4   :  { %13 = vsyncpa [#allocation4], 0 }
   0x5   :  { %15 = vsyncpa [#allocation4 + $0x1], 0  ;;  %s731_s9 = smov 0   ;;  %s733_s10 = smov 0  }
   0x6   :  { %s735_s11 = smov 0   ;;  %s737_s12 = smov 0  }
   0x7   :  { %s739_s13 = smov 0   ;;  %s741_s14 = smov 0  }
   0x8   :  { %s743_s15 = smov 0   ;;  %s745_s16 = smov 0  }
   0x9 LB: > { %s415_s17 = sadd.s32 4294967295, %s707_s16   ;;  %s416_s18 = sadd.s32 4294967294, %s707_s16   ;;  %s707_s16 = sphi %s745_s16, %s21_s16   ;;  %s703_s15 = sphi %s743_s15, %s963_s15   ;;  %s699_s14 = sphi %s741_s14, %s962_s14   ;;  %s695_s13 = sphi %s739_s13, %s932_s13   ;;  %s691_s12 = sphi %s737_s12, %s961_s12   ;;  %s687_s11 = sphi %s735_s11, %s960_s11   ;;  %s683_s10 = sphi %s733_s10, %s959_s10   ;;  %s679_s9 = sphi %s731_s9, %s958_s9  }
   0xa   : > { %s33_s19 = sadd.s32 1, %s703_s15  ;;  %p676_p1 = scmp.ne.s32.totalorder %s695_s13, 0 }
   0xb   : > { %p35_p0 = scmp.ge.s32.totalorder %s33_s19, 2  ;;  %p54_p2 = scmp.eq.s32.totalorder %s707_s16, 0 }
   0xc   : > { %p59_p3 = scmp.ne.s32.totalorder %s695_s13, %s691_s12  ;;  %p60_p5 = scmp.eq.s32.totalorder %s415_s17, 0 }
   0xd   : > { %s965_s19 = smov (%p35_p0, %s33_s19), 0  ;;  %p777_p4 = por %p676_p1, %p54_p2 }
   0xe   : > { %p781_p6 = por %p60_p5, %p59_p3  ;;  %s101_s22 = ssub.s32 %s703_s15, %s965_s19 }
   0xf   : > { %p102_p7 = scmp.eq.s32.totalorder %s101_s22, 0  ;;  %s104_s23 = sadd.s32 1, %s687_s11 }
  0x10   : > { %s948_s21 = scalar_select %p781_p6, 1, 0 }
  0x11   : > { %s789_s24 = scalar_select %p102_p7, %s687_s11, %s104_s23  }
  0x12   : > { %p114_p8 = scmp.ne.s32.totalorder %s687_s11, %s683_s10  ;;  %p115_p9 = scmp.eq.s32.totalorder %s415_s17, 1 }
  0x13   : > { %p120_p10 = scmp.ne.s32.totalorder %s683_s10, %s679_s9  ;;  %p121_p11 = scmp.eq.s32.totalorder %s416_s18, 1 }
  0x14   : > { %p795_p12 = por %p115_p9, %p114_p8  ;;  %p461_p1 = scmp.lt.s32.totalorder %s707_s16, 2 }
  0x15   : > { %p800_p0 = por %p121_p11, %p120_p10  ;;  %s709_s27 = smov [#allocation2]  }
  0x16   : > { %s949_s25 = scalar_select %p795_p12, 1, 0 }
  0x17   : > { %s950_s26 = scalar_select %p800_p0, 1, 0 }
  0x18   : > { %s155_s28 = sshll.u32 %s709_s27, 4  ;;  %p807_p2 = pnand %p461_p1, %p777_p4  ;;  %s156_s28 = int_to_ptr.vmem [resolvable:$true] %s155_s28 }
  0x19   : > { %s540_s4 = scalar_lea.hbm %s942_s0, 256 }
  0x1a   : > { %p541_p3 = scmp.ne.s32.totalorder %s942_s0, %s540_s4  ;;  %p542_p5 = pneg %p807_p2 }
  0x1b   : > { %p547_p8 = scmp.lt.u32.totalorder %s540_s4, %s540_s4  ;;  %p549_p9 = scmp.lt.u32.totalorder %s540_s4, %s942_s0 }
  0x1c   : > { %p543_p7 = pnand %p542_p5, %p541_p3 }
  0x1d   : > { %p550_p10 = por %p549_p9, %p547_p8 }
  0x1e   : > { %p544_p4 = pneg %p543_p7 }
  0x20   : > { %p551_p11 = pnand %p550_p10, %p544_p4 }
  0x22   : > { %554 = shalt.err (!%p551_p11)
}
  0x23   : > { %s555_s12 = scalar_lea.vmem %s156_s28, 256  ;;  %s562_s17 = scalar_lea.vmem %s156_s28, 512 }
  0x24   : > { %p556_p1 = scmp.ne.s32.totalorder %s156_s28, %s555_s12  ;;  %p563_p12 = scmp.lt.s32.totalorder %s156_s28, %s156_s28 }
  0x25   : > { %p564_p6 = scmp.lt.s32.totalorder %s562_s17, %s555_s12 }
  0x26   : > { %p558_p13 = pnand %p556_p1, %p542_p5 }
  0x27   : > { %p565_p3 = por %p564_p6, %p563_p12 }
  0x28   : > { %p559_p0 = pneg %p558_p13 }
  0x2a   : > { %p566_p7 = pnand %p565_p3, %p559_p0 }
  0x2c   : > { %569 = shalt.err (!%p566_p7)
}
  0x2d   : > { %s710_s18 = smov 128   ;;  %s711_s20 = smov 8  }
  0x2e   : > { %453 = dma.hbm_to_vmem [thread:$0]  (!%p807_p2), %s942_s0, 256, %s156_s28, [#allocation3], %s710_s18, %s710_s18, %s711_s20  }
  0x2f   : > { %p425_p13 = scmp.ge.s32.totalorder %s707_s16, 1  ;;  %p187_p4 = scmp.lt.s32.totalorder %s707_s16, 3 }
  0x30   : > { %s712_s30 = smov [#allocation5]   ;;  %s570_s6 = scalar_lea.hbm %s943_s1, 256 }
  0x31   : > { %p838_p8 = pnand %p425_p13, %p187_p4  ;;  %s179_s3 = sshll.u32 %s712_s30, 4  ;;  %s180_s3 = int_to_ptr.vmem [resolvable:$true] %s179_s3 }
  0x32   : > { %p571_p6 = scmp.ne.s32.totalorder %s943_s1, %s570_s6  ;;  %p577_p9 = scmp.lt.u32.totalorder %s570_s6, %s570_s6 }
  0x33   : > { %s952_s27 = scalar_select %p838_p8, 1, 0 }
  0x34   : > { %p573_p12 = pnand %p571_p6, %p542_p5  ;;  %p579_p10 = scmp.lt.u32.totalorder %s570_s6, %s943_s1 }
  0x36   : > { %p574_p0 = pneg %p573_p12  ;;  %p580_p11 = por %p579_p10, %p577_p9 }
  0x38   : > { %p581_p1 = pnand %p580_p11, %p574_p0 }
  0x3a   : > { %584 = shalt.err (!%p581_p1)
}
  0x3b   : > { %s585_s17 = scalar_lea.vmem %s180_s3, 256  ;;  %s592_s22 = scalar_lea.vmem %s180_s3, 512 }
  0x3c   : > { %p586_p3 = scmp.ne.s32.totalorder %s180_s3, %s585_s17  ;;  %p593_p4 = scmp.lt.s32.totalorder %s180_s3, %s180_s3 }
  0x3d   : > { %p594_p8 = scmp.lt.s32.totalorder %s592_s22, %s585_s17 }
  0x3e   : > { %p588_p7 = pnand %p586_p3, %p542_p5 }
  0x3f   : > { %p595_p6 = por %p594_p8, %p593_p4 }
  0x40   : > { %p589_p13 = pneg %p588_p7 }
  0x42   : > { %p596_p12 = pnand %p595_p6, %p589_p13 }
  0x44   : > { %599 = shalt.err (!%p596_p12)
}
  0x45   : > { %456 = dma.hbm_to_vmem [thread:$0]  (!%p807_p2), %s943_s1, 256, %s180_s3, [#allocation6], %s710_s18, %s710_s18, %s711_s20  }
  0x46   : > { %p953_p0 = scmp.ne.s32.totalorder %s952_s27, 0 }
  0x47   : > { %s193_s4 = sand.u32 (!%p953_p0), 1, %s695_s13   ;;  %p954_p5 = scmp.ne.s32.totalorder (!%p953_p0), %s948_s21, 0 }
  0x48   : > { %191 = sbr.rel (%p953_p0) target bundleno = 112 (0x70), region = 28  ;;  %s426_s5 = sshll.u32 (!%p953_p0), %s193_s4, 4 }
  0x49   : > { %s194_s6 = scalar_lea.sflag (!%p953_p0), [#allocation3], %s193_s4  ;;  %s197_s7 = scalar_lea.vmem (!%p953_p0), [#allocation2], %s426_s5 }
  0x4f   : > { %665 = dma.done.wait (%p954_p5), %s194_s6, 256  }
  0x50   : > { %667 = vsyncadd (%p954_p5), %s194_s6, 4294967040  ;;  %s203_s29 = scalar_lea.sflag [#allocation6], %s193_s4  ;;  %s206_s8 = scalar_lea.vmem [#allocation5], %s426_s5 }
  0x51   : > { %669 = dma.done.wait (%p954_p5), %s203_s29, 256  }
  0x52   : > { %671 = vsyncadd (%p954_p5), %s203_s29, 4294967040  ;;  %s428_s18 = sshll.u32 %s699_s14, 4  ;;  %v255_v0 = vlaneseq  ;;  %s229_s20 = sand.u32 1, %s683_s10   ;;  %v249_v6 = vld [vmem:[%s197_s7] sm:$0xff]  ;;  %v250_v7 = vld [vmem:[%s197_s7 + $0x8] sm:$0xff] }
  0x53   : > { %v258_v1 = vstv %s428_s18  ;;  %s442_s27 = smul.u32 40, %s229_s20  ;;  %v251_v8 = vld [vmem:[%s206_s8] sm:$0xff]  ;;  %v252_v10 = vld [vmem:[%s206_s8 + $0x8] sm:$0xff]  ;;  %p955_p8 = scmp.ne.s32.totalorder %s949_s25, 0 }
  0x54   : > { %v256_v2 = vshrl.u32 %v255_v0, 7  ;;  %s443_s21 = smul.u32 640, %s699_s14  ;;  %s890_s14 = scalar_lea.sflag [#allocation4], %s229_s20 }
  0x55   : > { %s231_s3 = scalar_lea.vmem [#allocation7], %s442_s27  ;;  %s713_s30 = smov [#allocation7]  }
  0x56   : > { %v257_v3 = vadd.s32 8, %v256_v2  ;;  %v259_v4 = vadd.s32 %v258_v1, %v256_v2  ;;  %s311_s28 = sshll.u32 %s231_s3, 4  ;;  %s884_s22 = scalar_lea.hbm %s944_s2, %s443_s21  ;;  %s886_s28 = int_to_ptr.vmem [resolvable:$true] %s311_s28 }
  0x57   : > { %s600_s23 = scalar_lea.vmem %s886_s28, 640  ;;  %s604_s4 = sshll.u32 %s713_s30, 4  ;;  %s605_s4 = int_to_ptr.vmem [resolvable:$false] %s604_s4 }
  0x58   : > { %v260_v5 = vadd.s32 %v258_v1, %v257_v3  ;;  %vm261_vm0 = vcmp.lt.s32.totalorder %v259_v4, 16  ;;  %p601_p2 = scmp.ne.s32.totalorder %s886_s28, %s600_s23  ;;  %s606_s5 = scalar_lea.vmem %s605_s4, 1280 }
  0x59   : > { %v263_v9 = vsel %vm261_vm0, %v249_v6, 0.0  ;;  %v265_v11 = vsel %vm261_vm0, %v251_v8, 0.0  ;;  %p607_p11 = scmp.lt.s32.totalorder %s886_s28, %s605_s4  ;;  %p608_p1 = scmp.lt.s32.totalorder %s606_s5, %s600_s23 }
  0x5a   : > { %vm262_vm1 = vcmp.lt.s32.totalorder %v260_v5, 16  ;;  %v278_v14 = vmul.f32 %v263_v9, %v263_v9  ;;  %v285_v15 = vmul.f32 %v265_v11, %v265_v11  ;;  %v292_v20 = vmul.f32 %v265_v11, %v263_v9  ;;  %p602_p9 = pnand %p601_p2, %p955_p8 }
  0x5b   : > { %v264_v12 = vsel %vm262_vm1, %v250_v7, 0.0  ;;  %v266_v13 = vsel %vm262_vm1, %v252_v10, 0.0  ;;  %p609_p3 = por %p608_p1, %p607_p11 }
  0x5c   : > { %v268_v16 = vadd.f32 %v264_v12, %v263_v9  ;;  %v273_v17 = vadd.f32 %v266_v13, %v265_v11  ;;  %v279_v18 = vmul.f32 %v264_v12, %v264_v12  ;;  %v286_v19 = vmul.f32 %v266_v13, %v266_v13  ;;  %p603_p10 = pneg %p602_p9 }
  0x5d   : > { %v293_v21 = vmul.f32 %v266_v13, %v264_v12 }
  0x5e   : > { %v280_v22 = vadd.f32 %v279_v18, %v278_v14  ;;  %v287_v23 = vadd.f32 %v286_v19, %v285_v15  ;;  %270 = vst [vmem:[%s231_s3] sm:$0xff] %v268_v16  ;;  %430 = vst [vmem:[%s231_s3 + $0x8] sm:$0xff] %v273_v17  ;;  %p610_p7 = pnand %p609_p3, %p603_p10 }
  0x5f   : > { %v294_v24 = vadd.f32 %v293_v21, %v292_v20 }
  0x60   : > { %432 = vst [vmem:[%s231_s3 + $0x10] sm:$0xff] %v280_v22  ;;  %434 = vst [vmem:[%s231_s3 + $0x18] sm:$0xff] %v287_v23 }
  0x61   : > { %436 = vst [vmem:[%s231_s3 + $0x20] sm:$0xff] %v294_v24 }
  0x62   : > { %613 = shalt.err (!%p610_p7)
}
  0x63   : > { %s614_s6 = scalar_lea.hbm %s884_s22, 640  ;;  %s618_s8 = scalar_lea.hbm %s944_s2, 1280 }
  0x64   : > { %p615_p13 = scmp.ne.s32.totalorder %s884_s22, %s614_s6  ;;  %p619_p12 = scmp.lt.u32.totalorder %s884_s22, %s944_s2 }
  0x65   : > { %p620_p0 = scmp.lt.u32.totalorder %s618_s8, %s614_s6  ;;  %p622_p2 = scmp.lt.u32.totalorder %s614_s6, %s884_s22 }
  0x66   : > { %p616_p4 = pnand %p615_p13, %p955_p8 }
  0x67   : > { %p621_p5 = por %p620_p0, %p619_p12 }
  0x68   : > { %p617_p6 = pneg %p616_p4 }
  0x69   : > { %p623_p9 = por %p622_p2, %p621_p5 }
  0x6b   : > { %p624_p10 = pnand %p623_p9, %p617_p6 }
  0x6d   : > { %627 = shalt.err (!%p624_p10)
}
  0x6e   : > { %s714_s27 = smov 128   ;;  %s715_s21 = smov 8  }
  0x6f   : > { %448 = dma.vmem_to_hbm [thread:$0]  (%p955_p8), %s886_s28, 640, %s884_s22, %s890_s14, %s714_s27, %s714_s27, %s715_s21  }
  0x70 PF: > { %s326_s3 = sand.u32 1, %s679_s9   ;;  %p956_p11 = scmp.ne.s32.totalorder %s950_s26, 0 }
  0x71   : > { %p957_p1 = scmp.ge.s32.totalorder %s707_s16, 2  ;;  %s327_s12 = scalar_lea.sflag [#allocation4], %s326_s3 }
  0x73   : > { %p458_p3 = pnand %p957_p1, %p956_p11 }
  0x75   : > { %673 = dma.done.wait (!%p458_p3), %s327_s12, 640  }
  0x76   : > { %675 = vsyncadd (!%p458_p3), %s327_s12, 4294966656  ;;  %s21_s16 = sadd.s32 1, %s707_s16   ;;  %s958_s9 = smov %s683_s10 }
  0x77   : > { %p18_p7 = scmp.ge.s32.totalorder %s21_s16, 4   ;;  %s959_s10 = smov %s687_s11 }
  0x78   : > { %s960_s11 = smov %s789_s24  ;;  %s961_s12 = smov %s695_s13 }
  0x79   : > { %s932_s13 = smov 0   ;;  %s962_s14 = smov %s703_s15 }
  0x7a   : > { %s963_s15 = smov %s965_s19  ;;  %20 = sbr.rel (!%p18_p7) target bundleno = 9 (0x9), region = 94 }
  0x81   :  { %332 = vsyncpa [#allocation3], 1 }
  0x82   :  { %334 = vsyncpa [#allocation3 + $0x1], 1 }
  0x83   :  { %335 = vsyncpa [#allocation6], 1 }
  0x84   :  { %337 = vsyncpa [#allocation6 + $0x1], 1 }
  0x85   :  { %338 = vsyncpa [#allocation4], 1 }
  0x86   :  { %340 = vsyncpa [#allocation4 + $0x1], 1 }

</bundles_post_ra>
